<compile_context>
chip_gen: v5e
topology: v5e:2x2
jax: 0.10.0
libtpu: 0.0.40
codegen_flags: <defaults>
</compile_context>

<pallas_src>
import functools

import jax
import jax.numpy as jnp
from jax.experimental import pallas as pl
from jax.experimental.pallas import tpu as pltpu


def _round_up(x, m):
    return ((x + m - 1) // m) * m


_VMEM_LIMIT = 32 * 1024 * 1024       # explicit scoped VMEM, safe on v5e/v6e/v7x
_BLOCK_BUDGET = 6 * 1024 * 1024      # bytes per block; 4x (in+out, 2-deep) <= 24 MiB


# --------------- Fused kernel: pool + 1x1 conv + sigmoid + scale ---------------

def _fca_fused_kernel(x_ref, wt_ref, b_ref, o_ref):
    # x_ref : (g, C, HW) resident image-group slab (native dtype)
    # wt_ref: (C, C) f32 == conv_weight.T / (H*W)   (mean's /HW folded in)
    # b_ref : (1, C) f32
    # o_ref : (g, C, HW)
    x = x_ref[...]
    sums = jnp.sum(x.astype(jnp.float32), axis=2)                  # (g, C)
    y = jnp.dot(sums, wt_ref[...], preferred_element_type=jnp.float32) + b_ref[...]
    s = jax.nn.sigmoid(y)                                          # (g, C) f32 gate
    # Multiply in the native input dtype (keeps store traffic / vregs minimal).
    o_ref[...] = x * s[:, :, None].astype(o_ref.dtype)


def _fca_fused(x3, wt_scaled, b2):
    N, C, HW = x3.shape
    itemsize = jnp.dtype(x3.dtype).itemsize
    per_image = C * HW * itemsize

    # Largest divisor g of N whose (g, C, HW) block fits the budget, while
    # keeping >= 2 grid blocks when N >= 2 so both v7x TensorCores get work.
    g = 1
    for cand in range(N, 0, -1):
        if N % cand:
            continue
        if cand * per_image > _BLOCK_BUDGET:
            continue
        if N >= 2 and cand == N:
            continue
        g = cand
        break
    grid = (N // g,)

    return pl.pallas_call(
        _fca_fused_kernel,
        out_shape=jax.ShapeDtypeStruct((N, C, HW), x3.dtype),
        grid_spec=pltpu.PrefetchScalarGridSpec(
            num_scalar_prefetch=0,
            grid=grid,
            in_specs=[
                # Last two block dims equal the full array dims -> legal for
                # any C / HW, no padding of the feature map required.
                pl.BlockSpec((g, C, HW), lambda b: (b, 0, 0)),
                pl.BlockSpec((C, C), lambda b: (0, 0)),
                pl.BlockSpec((1, C), lambda b: (0, 0)),
            ],
            out_specs=pl.BlockSpec((g, C, HW), lambda b: (b, 0, 0)),
        ),
        compiler_params=pltpu.CompilerParams(
            dimension_semantics=("parallel",),
            vmem_limit_bytes=_VMEM_LIMIT,
        ),
        cost_estimate=pl.CostEstimate(
            flops=2 * N * C * HW + 2 * N * C * C,
            transcendentals=N * C,
            bytes_accessed=2 * N * C * HW * itemsize,
        ),
    )(x3, wt_scaled, b2)


# --------------- Fallback two-pass path (single image slab > budget) ---------------

def _pool_sum_kernel(hw_total, x_ref, sum_ref):
    # x_ref   : (R, T) tile of the (N*C, HW) slab
    # sum_ref : (R, 1) per-row running sum (f32), resident across the HW axis
    h = pl.program_id(1)

    @pl.when(h == 0)
    def _init():
        sum_ref[...] = jnp.zeros_like(sum_ref)

    x = x_ref[...].astype(jnp.float32)
    T = x_ref.shape[-1]
    if hw_total % T != 0:
        # Ragged last HW tile: OOB lane reads are unspecified, mask them out.
        lane = jax.lax.broadcasted_iota(jnp.int32, x.shape, dimension=1)
        x = jnp.where(h * T + lane < hw_total, x, 0.0)
    sum_ref[...] += jnp.sum(x, axis=1, keepdims=True)


def _scale_kernel(x_ref, s_ref, o_ref):
    # x_ref : (R, T); s_ref : (R, 1) f32 gate; o_ref : (R, T)
    o_ref[...] = x_ref[...] * s_ref[...].astype(o_ref.dtype)


def _fca_two_pass(x2, wt_scaled, b2, N, C):
    NC, HW = x2.shape
    itemsize = jnp.dtype(x2.dtype).itemsize

    # Row tile: multiple of 8 (or full NC when NC < 8); capped so that the
    # "parallel" row axis has >= 2 blocks when possible (v7x megacore).
    if NC < 8:
        R = NC
    else:
        R = min(256, (NC // 8) * 8)
        if NC >= 16:
            R = min(R, max(8, ((NC // 2) // 8) * 8))
    # Lane tile: multiple of 128 sized from the byte budget (never 128-lane
    # fallback); ragged last tile handled in-kernel / by masked edge stores.
    T = max(128, min(_round_up(HW, 128),
                     (_BLOCK_BUDGET // (R * itemsize)) // 128 * 128))
    grid = (pl.cdiv(NC, R), pl.cdiv(HW, T))

    # Pass 1: per-(n, c) spatial sums (reduction axis last, "arbitrary").
    sums = pl.pallas_call(
        functools.partial(_pool_sum_kernel, HW),
        out_shape=jax.ShapeDtypeStruct((NC, 1), jnp.float32),
        grid_spec=pltpu.PrefetchScalarGridSpec(
            num_scalar_prefetch=0,
            grid=grid,
            in_specs=[pl.BlockSpec((R, T), lambda r, h: (r, h))],
            out_specs=pl.BlockSpec((R, 1), lambda r, h: (r, 0)),
        ),
        compiler_params=pltpu.CompilerParams(
            dimension_semantics=("parallel", "arbitrary"),
            vmem_limit_bytes=_VMEM_LIMIT,
        ),
        cost_estimate=pl.CostEstimate(
            flops=NC * HW,
            transcendentals=0,
            bytes_accessed=NC * HW * itemsize + NC * 4,
        ),
    )(x2)

    # Tiny 1x1 conv + sigmoid in plain JAX (not worth a kernel launch).
    y = sums.reshape(N, C) @ wt_scaled + b2
    s_rows = jax.nn.sigmoid(y).reshape(NC, 1)

    # Pass 2: broadcast channel-wise scale (fully parallel tiled grid).
    out2 = pl.pallas_call(
        _scale_kernel,
        out_shape=jax.ShapeDtypeStruct((NC, HW), x2.dtype),
        grid_spec=pltpu.PrefetchScalarGridSpec(
            num_scalar_prefetch=0,
            grid=grid,
            in_specs=[
                pl.BlockSpec((R, T), lambda r, h: (r, h)),
                pl.BlockSpec((R, 1), lambda r, h: (r, 0)),
            ],
            out_specs=pl.BlockSpec((R, T), lambda r, h: (r, h)),
        ),
        compiler_params=pltpu.CompilerParams(
            dimension_semantics=("parallel", "parallel"),
            vmem_limit_bytes=_VMEM_LIMIT,
        ),
        cost_estimate=pl.CostEstimate(
            flops=NC * HW,
            transcendentals=0,
            bytes_accessed=2 * NC * HW * itemsize,
        ),
    )(x2, s_rows)
    return out2


# ------------------------------------ Wrapper ------------------------------------

def fca_forward(x_nchw, weight, bias):
    """x_nchw: (N, C, H, W); weight: (C_out, C_in) of the 1x1 conv; bias: (C_out,)."""
    N, C, H, W = x_nchw.shape
    C_out, C_in = weight.shape
    assert C == C_in and C_out == C_in, "FCA requires in_channels == out_channels"
    HW = H * W
    itemsize = jnp.dtype(x_nchw.dtype).itemsize

    # Fold the mean's 1/(H*W) into the conv weight; gate math in f32.
    wt_scaled = weight.T.astype(jnp.float32) / float(HW)    # (C_in, C_out)
    b2 = bias.reshape(1, C_out).astype(jnp.float32)

    x3 = x_nchw.reshape(N, C, HW)                            # view, no copy
    if C * HW * itemsize <= _BLOCK_BUDGET:
        out3 = _fca_fused(x3, wt_scaled, b2)
        return out3.reshape(N, C, H, W)

    out2 = _fca_two_pass(x3.reshape(N * C, HW), wt_scaled, b2, N, C)
    return out2.reshape(N, C, H, W)


if __name__ == "__main__":
    # Small shapes consistent with the module: N=2, C=4, H=W=16.
    N, C, H, W = 2, 4, 16, 16
    key = jax.random.PRNGKey(0)
    kx, kw, kb = jax.random.split(key, 3)

    x = jax.random.normal(kx, (N, C, H, W), dtype=jnp.float32)
    # Deterministic synthetic 1x1-conv parameters (in_channels == out_channels).
    weight = jax.random.normal(kw, (C, C), dtype=jnp.float32) * 0.1
    bias = jax.random.normal(kb, (C,), dtype=jnp.float32) * 0.1

    fca = jax.jit(fca_forward)
    out = fca(x, weight, bias)
    jax.block_until_ready(out)

    # Pure-JAX reference for sanity check.
    avg = jnp.mean(x, axis=(2, 3))                  # (N, C)
    y = avg @ weight.T + bias                       # (N, C)
    s = jax.nn.sigmoid(y)[:, :, None, None]         # (N, C, 1, 1)
    ref = x * s
    assert jnp.allclose(out, ref, atol=1e-5, rtol=1e-5), "mismatch vs reference"

    print("KERNEL_OK")
</pallas_src>

<mosaic_0001>
module attributes {stable_mosaic.version = 11 : i64} {
  func.func @_fca_fused_kernel(%arg0: i32, %arg1: memref<1x4x256xf32, #tpu.memory_space<vmem>>, %arg2: memref<4x4xf32, #tpu.memory_space<vmem>>, %arg3: memref<1x4xf32, #tpu.memory_space<vmem>>, %arg4: memref<1x4x256xf32, #tpu.memory_space<vmem>>) attributes {dimension_semantics = [#tpu.dimension_semantics<parallel>], iteration_bounds = array<i64: 2>, scalar_prefetch = 0 : i64, scratch_operands = 0 : i64, tpu.core_type = #tpu.core_type<tc>, window_params = [{transform_indices = @transform_0, window_bounds = array<i64: 1, 4, 256>}, {pipeline_mode = #tpu.pipeline_mode<synchronous>, transform_indices = @transform_1, window_bounds = array<i64: 4, 4>}, {pipeline_mode = #tpu.pipeline_mode<synchronous>, transform_indices = @transform_2, window_bounds = array<i64: 1, 4>}, {transform_indices = @transform_3, window_bounds = array<i64: 1, 4, 256>}]} {
    %c0 = arith.constant 0 : index
    %c0_0 = arith.constant 0 : index
    %c0_1 = arith.constant 0 : index
    %0 = vector.load %arg1[%c0, %c0_0, %c0_1] : memref<1x4x256xf32, #tpu.memory_space<vmem>>, vector<1x4x256xf32>
    %cst = arith.constant dense<0.000000e+00> : vector<1x4xf32>
    %1 = vector.multi_reduction <add>, %0, %cst [2] : vector<1x4x256xf32> to vector<1x4xf32>
    %c0_2 = arith.constant 0 : index
    %c0_3 = arith.constant 0 : index
    %2 = vector.load %arg2[%c0_2, %c0_3] : memref<4x4xf32, #tpu.memory_space<vmem>>, vector<4x4xf32>
    %cst_4 = arith.constant dense<0.000000e+00> : vector<1x4xf32>
    %3 = tpu.matmul %1, %2, %cst_4 {dimension_numbers = #tpu.dot_dimension_numbers<[1], [0], [0], [1], [0, 0, 1, 1], [], []>} : vector<1x4xf32>, vector<4x4xf32>, vector<1x4xf32> -> vector<1x4xf32>
    %c0_5 = arith.constant 0 : index
    %c0_6 = arith.constant 0 : index
    %4 = vector.load %arg3[%c0_5, %c0_6] : memref<1x4xf32, #tpu.memory_space<vmem>>, vector<1x4xf32>
    %5 = arith.addf %3, %4 : vector<1x4xf32>
    %6 = arith.negf %5 : vector<1x4xf32>
    %7 = math.exp %6 : vector<1x4xf32>
    %cst_7 = arith.constant 1.000000e+00 : f32
    %8 = vector.broadcast %cst_7 : f32 to vector<1x4xf32>
    %9 = arith.addf %8, %7 : vector<1x4xf32>
    %10 = arith.divf %8, %9 : vector<1x4xf32>
    %11 = vector.shape_cast %10 : vector<1x4xf32> to vector<1x4x1xf32>
    %12 = vector.broadcast %11 : vector<1x4x1xf32> to vector<1x4x256xf32>
    %13 = arith.mulf %0, %12 : vector<1x4x256xf32>
    %c0_8 = arith.constant 0 : index
    %c0_9 = arith.constant 0 : index
    %c0_10 = arith.constant 0 : index
    %14 = vector.load %arg4[%c0_8, %c0_9, %c0_10] : memref<1x4x256xf32, #tpu.memory_space<vmem>>, vector<1x4x256xf32>
    tpu.vector_store %arg4[%c0_8, %c0_9, %c0_10], %13 {strides = array<i32>} : memref<1x4x256xf32, #tpu.memory_space<vmem>>, vector<1x4x256xf32>,
    return
  }
  func.func @transform_0(%arg0: i32) -> (i32, i32, i32) {
    %c0_i32 = arith.constant 0 : i32
    %c0_i32_0 = arith.constant 0 : i32
    %c0_i32_1 = arith.constant 0 : i32
    return %arg0, %c0_i32, %c0_i32_0 : i32, i32, i32
  }
  func.func @transform_1(%arg0: i32) -> (i32, i32) {
    %c0_i32 = arith.constant 0 : i32
    %c0_i32_0 = arith.constant 0 : i32
    %c0_i32_1 = arith.constant 0 : i32
    return %c0_i32, %c0_i32_0 : i32, i32
  }
  func.func @transform_2(%arg0: i32) -> (i32, i32) {
    %c0_i32 = arith.constant 0 : i32
    %c0_i32_0 = arith.constant 0 : i32
    %c0_i32_1 = arith.constant 0 : i32
    return %c0_i32, %c0_i32_0 : i32, i32
  }
  func.func @transform_3(%arg0: i32) -> (i32, i32, i32) {
    %c0_i32 = arith.constant 0 : i32
    %c0_i32_0 = arith.constant 0 : i32
    %c0_i32_1 = arith.constant 0 : i32
    return %arg0, %c0_i32, %c0_i32_0 : i32, i32, i32
  }
}

</mosaic_0001>

<bundles_post_ra>
// kernel: fca_forward.1
= control target key start
LH: loop header
LB: loop body
LE: loop exit
PB: predicated region body
PF: predicated region fallthrough
CT: control target
= control target key end

     0   :  { %s364_s12 = smov 0   ;;  %s394_s0 = inlined_call_operand.vmem [shape: f32[2,4,256], index: 0, kind: input, shape index: {}]   ;;  %s395_s1 = inlined_call_operand.vmem [shape: f32[4,4], index: 1, kind: input, shape index: {}]   ;;  %s396_s2 = inlined_call_operand.vmem [shape: f32[1,4], index: 2, kind: input, shape index: {}]   ;;  %s397_s3 = inlined_call_operand.vmem [shape: f32[2,4,256], index: 3, kind: output, shape index: {}]  }
   0x1 LB: > { %s305_s13 = sadd.s32 4294967295, %s341_s12   ;;  %p309_p0 = scmp.ge.s32.totalorder %s341_s12, 1  ;;  %s341_s12 = sphi %s364_s12, %s13_s12  }
   0x2   : > { %p137_p1 = scmp.lt.s32.totalorder %s341_s12, 3 }
   0x4   : > { %p138_p2 = pnand %p309_p0, %p137_p1 }
   0x5   : > { %p161_p3 = scmp.lt.s32.totalorder (!%p138_p2), %s305_s13, 1 }
   0x6   : > { %141 = sbr.rel (%p138_p2) target bundleno = 422 (0x1a6), region = 32 }
   0xb   : > { %s399_s13 = smov (!%p161_p3, %s305_s13), 1  ;;  %vm178_vm0 = vcmask 1043456   ;;  %v184_v6 = vld [vmem:[%s395_s1] sm:$0xf]  ;;  %v187_v7 = vlaneseq  ;;  %vm190_vm1 = vcmask 31744  }
   0xc   : > { %s319_s14 = sshll.u32 %s399_s13, 3  ;;  %314 = vmatpush.msk.msra.mxu0 %vm178_vm0, %v184_v6  ;;  %v185_v12 = vld [vmem:[%s396_s2] sm:$0x1]  ;;  %v343_v29 = vmov 839922192  }
   0xd   : > { %s165_s17 = scalar_lea.vmem %s394_s0, %s319_s14  ;;  %v188_v8 = vand.u32 127, %v187_v7  ;;  %v237_v11 = vshrl.u32 %v187_v7, 7  ;;  %v244_v30 = vunpack.c.l.s4 %v343_v29  ;;  %s170_s24 = scalar_lea.vmem %s397_s3, %s319_s14 }
   0xe   : > { %v171_v0 = vld [vmem:[%s165_s17] sm:$0xff] }
   0xf   : > { %173 = vst [vmem:[#allocation1] ss:$2 sm:$0xff] %v171_v0  ;;  %330 = vset.pattern.permute.xlu0 %v237_v11  ;;  %v245_v31 = vunpack.c.0.s8 %v244_v30 }
  0x16   : > { %v174_v1 = vld.sshfl [vmem:[#allocation1] sm:$0xff pattern:$0x75316420]  ;;  %v175_v2 = vld.sshfl [vmem:[#allocation1 + $0x8] sm:$0xff pattern:$0x75316420] }
  0x17   : > { %v179_v3 = vsel %vm178_vm0, %v174_v1, 0.0  ;;  %v180_v4 = vsel %vm178_vm0, %v175_v2, 0.0 }
  0x18   : > { %v181_v5 = vadd.f32 %v180_v4, %v179_v3 }
  0x1a   : > { %182 = vadd.xlane.f32.xlu0 %v181_v5 }
  0x8d   : > { %v183_v9 = vpop.xlane.xlu0 %182 }
  0x8e   : > { %v189_v10 = vperm.slane %v183_v9, %v188_v8 }
  0x90   : > { %315 = vmatmul.msk.f32.vlgmr.msra.gmra.mxu0 %vm190_vm1, %v189_v10 }
 0x10d   : > { %v213_v13 = vpop.f32.mrf.mxu0 }
 0x10e   : > { %v214_v14 = vadd.f32 %v213_v13, %v185_v12 }
 0x110   : > { %v316_v15 = vmul.f32 -1.442695, %v214_v14 }
 0x112   : > { %331 = vpow2.f32 %v316_v15 }
 0x118   : > { %v332_v16 = vpop.eup %331 }
 0x119   : > { %v219_v17 = vadd.f32 1.0, %v332_v16 }
 0x11b   : > { %333 = vrcp.f32 %v219_v17  ;;  %v231_v21 = vand.u32 2147483648, %v219_v17  ;;  %v229_v23 = vand.u32 2147483647, %v219_v17  ;;  %vm225_vm3 = vweird.f32 %v219_v17 }
 0x11d   : > { %v232_v25 = vor.u32 1.1754944e-38, %v231_v21  ;;  %vm230_vm5 = vcmp.eq.f32.partialorder %v229_v23, 8.507059e+37 }
 0x121   : > { %v334_v18 = vpop.eup %333 }
 0x122   : > { %v221_v19 = vmul.f32 %v334_v18, %v219_v17  ;;  %vm226_vm2 = vweird.f32 %v334_v18 }
 0x123   : > { %vm227_vm4 = vmor %vm225_vm3, %vm226_vm2 }
 0x124   : > { %v222_v20 = vsub.f32 1.0, %v221_v19 }
 0x126   : > { %v223_v22 = vmul.f32 %v334_v18, %v222_v20 }
 0x128   : > { %v224_v24 = vadd.f32 %v334_v18, %v223_v22 }
 0x12a   : > { %v228_v26 = vsel %vm227_vm4, %v334_v18, %v224_v24 }
 0x12b   : > { %v233_v27 = vsel %vm230_vm5, %v232_v25, %v228_v26 }
 0x12c   : > { %v235_v28 = vperm.slane %v233_v27, 0 }
 0x12e   : > { %240 = vperm.xlu0 %330, %v235_v28  }
 0x1a0   : > { %v241_v32 = vpop.permute.xlu0 %240 }
 0x1a1   : > { %v246_v33 = vperm.slane %v241_v32, %v245_v31 }
 0x1a3   : > { %v248_v34 = vmul.f32 %v246_v33, %v171_v0 }
 0x1a5   : > { %249 = vst [vmem:[%s170_s24] sm:$0xff] %v248_v34 }
 0x1a6 PF: > { %s13_s12 = sadd.s32 1, %s341_s12  }
 0x1a7   : > { %p10_p4 = scmp.ge.s32.totalorder %s13_s12, 4  }
 0x1a9   :  { %12 = sbr.rel (!%p10_p4) target bundleno = 1 (0x1), region = 62 }

</bundles_post_ra>
